<compile_context>
chip_gen: v7x
topology: tpu7x:2x2x1
jax: 0.10.0
libtpu: 0.0.40
codegen_flags: <defaults>
</compile_context>

<pallas_src>
import jax
import jax.numpy as jnp
import numpy as np
from jax.experimental import pallas as pl
from jax.experimental.pallas import tpu as pltpu


def _round_up(x, m):
    return (x + m - 1) // m * m


# ------------- TemporalBlock: weight_norm Conv1d + bias + ReLU (+ dropout) ----

def _temporal_block_kernel(xcol_ref, w_ref, b_ref, o_ref):
    # xcol_ref: (C_in*K, TN) bf16   w_ref: (C_out, C_in*K) bf16
    # b_ref:    (C_out, 1)   f32    o_ref: (C_out, TN)     f32
    acc = jnp.dot(w_ref[...], xcol_ref[...],
                  preferred_element_type=jnp.float32)   # single MXU matmul
    acc = acc + b_ref[...]                              # bias (broadcast over TN)
    o_ref[...] = jnp.maximum(acc, 0.0)                  # ReLU
    # Dropout: module forward in eval mode is identity.
    # TODO(synk): train-mode dropout would use pltpu.prng_seed/prng_random_bits.


def temporal_block_forward(act, v, g, bias, *, kernel_size, dilation, padding,
                           stride=1, lane_tile=512):
    """One TemporalBlock. act: (C_in, B, L) f32 -> (C_out, B, L_out) f32."""
    assert stride == 1, "TCNModel always builds TemporalBlock with stride=1"
    c_in, B, L = act.shape
    c_out, _, K = v.shape
    l_out = L + 2 * padding - dilation * (K - 1)

    # weight_norm (parameter glue): w = g * v / ||v||_(dims 1,2)
    v32 = v.astype(jnp.float32)
    norm = jnp.sqrt(jnp.sum(v32 * v32, axis=(1, 2), keepdims=True))
    w = g.astype(jnp.float32) * v32 / norm                       # (C_out, C_in, K)
    w_flat = jnp.transpose(w, (0, 2, 1)).reshape(c_out, K * c_in)

    # im2col: (C_in*K, B*L_out); batch is folded into the lane axis.
    x_pad = jnp.pad(act, ((0, 0), (0, 0), (padding, padding)))
    cols = [x_pad[:, :, k * dilation:k * dilation + l_out] for k in range(K)]
    xcol = jnp.concatenate(cols, axis=0).reshape(K * c_in, B * l_out)

    n = B * l_out
    tn = min(lane_tile, _round_up(n, 128))     # lane-dense tile, multiple of 128
    n_pad = _round_up(n, tn)
    xcol = jnp.pad(xcol, ((0, 0), (0, n_pad - n)))

    out2d = pl.pallas_call(
        _temporal_block_kernel,
        out_shape=jax.ShapeDtypeStruct((c_out, n_pad), jnp.float32),
        grid=(n_pad // tn,),
        in_specs=[
            pl.BlockSpec((K * c_in, tn), lambda i: (0, i)),
            pl.BlockSpec((c_out, K * c_in), lambda i: (0, 0)),
            pl.BlockSpec((c_out, 1), lambda i: (0, 0)),
        ],
        out_specs=pl.BlockSpec((c_out, tn), lambda i: (0, i)),
        compiler_params=pltpu.CompilerParams(
            dimension_semantics=("parallel",),
            vmem_limit_bytes=32 * 1024 * 1024),
    )(xcol.astype(jnp.bfloat16), w_flat.astype(jnp.bfloat16),
      bias.reshape(c_out, 1).astype(jnp.float32))

    return out2d[:, :n].reshape(c_out, B, l_out)


# ------------- Head: mean over time -> Linear -> sigmoid ----------------------

def _head_kernel(x_ref, w_ref, b_ref, o_ref):
    # x_ref: (C, B, L) f32  w_ref: (O, C) f32  b_ref: (O, 1) f32  o_ref: (O, B)
    pooled = jnp.mean(x_ref[...], axis=2)                        # (C, B)
    logits = jnp.dot(w_ref[...], pooled,
                     preferred_element_type=jnp.float32) + b_ref[...]
    o_ref[...] = jax.nn.sigmoid(logits)


def head_forward(act, fc_w, fc_b):
    """mean(dim=time) + Linear + sigmoid. act: (C, B, L) -> (B, O)."""
    C, B, L = act.shape
    O = fc_w.shape[0]
    out = pl.pallas_call(
        _head_kernel,
        out_shape=jax.ShapeDtypeStruct((O, B), jnp.float32),
        grid=(1,),
        in_specs=[
            pl.BlockSpec((C, B, L), lambda i: (0, 0, 0)),
            pl.BlockSpec((O, C), lambda i: (0, 0)),
            pl.BlockSpec((O, 1), lambda i: (0, 0)),
        ],
        out_specs=pl.BlockSpec((O, B), lambda i: (0, 0)),
        compiler_params=pltpu.CompilerParams(
            dimension_semantics=("arbitrary",)),
    )(act, fc_w.astype(jnp.float32), fc_b.reshape(O, 1).astype(jnp.float32))
    return out.T                                                  # (B, O)


# ------------- Full TCNModel forward ------------------------------------------

def tcn_model_forward(x, params, *, kernel_size=3):
    """TCNModel.forward. x: (B, L, input_dim) or (B, input_dim)."""
    if x.ndim == 2:
        x = x[:, None, :]                 # torch: unsqueeze(1)
    # torch: x.permute(0, 2, 1) -> (B, C, L); internal layout here is (C, B, L).
    act = jnp.transpose(x, (2, 0, 1)).astype(jnp.float32)
    for blk in params["blocks"]:
        act = temporal_block_forward(act, blk["v"], blk["g"], blk["bias"],
                                     kernel_size=kernel_size,
                                     dilation=blk["dilation"],
                                     padding=blk["padding"])
    out = head_forward(act, params["fc_w"], params["fc_b"])       # (B, output_dim)
    return jnp.squeeze(out)


def init_params(key, input_dim, output_dim, num_channels, kernel_size=3):
    blocks = []
    in_ch = input_dim
    for i, out_ch in enumerate(num_channels):
        key, kv, kg, kb = jax.random.split(key, 4)
        blocks.append(dict(
            v=jax.random.normal(kv, (out_ch, in_ch, kernel_size),
                                jnp.float32) * 0.3,
            g=jax.random.uniform(kg, (out_ch, 1, 1), jnp.float32, 0.5, 1.5),
            bias=jax.random.normal(kb, (out_ch,), jnp.float32) * 0.1,
            dilation=2 ** i,
            padding=(kernel_size - 1) * (2 ** i),
        ))
        in_ch = out_ch
    key, kw, kb2 = jax.random.split(key, 3)
    fc_w = jax.random.normal(kw, (output_dim, num_channels[-1]),
                             jnp.float32) * 0.3
    fc_b = jax.random.normal(kb2, (output_dim,), jnp.float32) * 0.1
    return dict(blocks=blocks, fc_w=fc_w, fc_b=fc_b)


# ------------- Plain-JAX reference (bf16 operands to match kernel path) -------

def _reference_model(x, params, *, kernel_size=3):
    if x.ndim == 2:
        x = x[:, None, :]
    act = jnp.transpose(x, (0, 2, 1)).astype(jnp.float32)        # (B, C, L)
    for blk in params["blocks"]:
        v32 = blk["v"].astype(jnp.float32)
        norm = jnp.sqrt(jnp.sum(v32 * v32, axis=(1, 2), keepdims=True))
        w = blk["g"].astype(jnp.float32) * v32 / norm
        y = jax.lax.conv_general_dilated(
            act.astype(jnp.bfloat16), w.astype(jnp.bfloat16),
            window_strides=(1,),
            padding=[(blk["padding"], blk["padding"])],
            rhs_dilation=(blk["dilation"],),
            dimension_numbers=("NCH", "OIH", "NCH"),
            preferred_element_type=jnp.float32)
        act = jnp.maximum(
            y + blk["bias"].astype(jnp.float32)[None, :, None], 0.0)
    pooled = act.mean(axis=2)                                     # (B, C)
    logits = pooled @ params["fc_w"].astype(jnp.float32).T \
        + params["fc_b"].astype(jnp.float32)
    return jnp.squeeze(jax.nn.sigmoid(logits))


if __name__ == "__main__":
    # TCNModel(input_dim=4, output_dim=1, num_channels=[8, 16], kernel_size=3)
    input_dim, output_dim = 4, 1
    num_channels = (8, 16)
    kernel_size = 3
    B, L = 2, 16

    key = jax.random.PRNGKey(0)
    key, kx = jax.random.split(key)
    x = jax.random.normal(kx, (B, L, input_dim), dtype=jnp.float32)
    params = init_params(key, input_dim, output_dim, num_channels, kernel_size)

    out = tcn_model_forward(x, params, kernel_size=kernel_size)
    out = jax.block_until_ready(out)

    ref = _reference_model(x, params, kernel_size=kernel_size)
    np.testing.assert_allclose(np.asarray(out), np.asarray(ref),
                               rtol=1e-2, atol=1e-2)
    print("KERNEL_OK")
</pallas_src>

<mosaic_0001>
module attributes {stable_mosaic.version = 11 : i64} {
  func.func @_temporal_block_kernel(%arg0: i32, %arg1: memref<12x128xbf16, #tpu.memory_space<vmem>>, %arg2: memref<8x12xbf16, #tpu.memory_space<vmem>>, %arg3: memref<8x1xf32, #tpu.memory_space<vmem>>, %arg4: memref<8x128xf32, #tpu.memory_space<vmem>>) attributes {dimension_semantics = [#tpu.dimension_semantics<parallel>], iteration_bounds = array<i64: 1>, scalar_prefetch = 0 : i64, scratch_operands = 0 : i64, tpu.core_type = #tpu.core_type<tc>, window_params = [{transform_indices = @transform_0, window_bounds = array<i64: 12, 128>}, {pipeline_mode = #tpu.pipeline_mode<synchronous>, transform_indices = @transform_1, window_bounds = array<i64: 8, 12>}, {pipeline_mode = #tpu.pipeline_mode<synchronous>, transform_indices = @transform_2, window_bounds = array<i64: 8, 1>}, {transform_indices = @transform_3, window_bounds = array<i64: 8, 128>}]} {
    %c0 = arith.constant 0 : index
    %c0_0 = arith.constant 0 : index
    %0 = vector.load %arg2[%c0, %c0_0] : memref<8x12xbf16, #tpu.memory_space<vmem>>, vector<8x12xbf16>
    %c0_1 = arith.constant 0 : index
    %c0_2 = arith.constant 0 : index
    %1 = vector.load %arg1[%c0_1, %c0_2] : memref<12x128xbf16, #tpu.memory_space<vmem>>, vector<12x128xbf16>
    %cst = arith.constant dense<0.000000e+00> : vector<8x128xf32>
    %2 = tpu.matmul %0, %1, %cst {dimension_numbers = #tpu.dot_dimension_numbers<[1], [0], [0], [1], [0, 0, 1, 1], [], []>} : vector<8x12xbf16>, vector<12x128xbf16>, vector<8x128xf32> -> vector<8x128xf32>
    %c0_3 = arith.constant 0 : index
    %c0_4 = arith.constant 0 : index
    %3 = vector.load %arg3[%c0_3, %c0_4] : memref<8x1xf32, #tpu.memory_space<vmem>>, vector<8x1xf32>
    %4 = vector.broadcast %3 : vector<8x1xf32> to vector<8x128xf32>
    %5 = arith.addf %2, %4 : vector<8x128xf32>
    %cst_5 = arith.constant 0.000000e+00 : f32
    %6 = vector.broadcast %cst_5 : f32 to vector<8x128xf32>
    %7 = arith.maximumf %5, %6 : vector<8x128xf32>
    %c0_6 = arith.constant 0 : index
    %c0_7 = arith.constant 0 : index
    %8 = vector.load %arg4[%c0_6, %c0_7] : memref<8x128xf32, #tpu.memory_space<vmem>>, vector<8x128xf32>
    tpu.vector_store %arg4[%c0_6, %c0_7], %7 {strides = array<i32>} : memref<8x128xf32, #tpu.memory_space<vmem>>, vector<8x128xf32>,
    return
  }
  func.func @transform_0(%arg0: i32) -> (i32, i32) {
    %c0_i32 = arith.constant 0 : i32
    %c0_i32_0 = arith.constant 0 : i32
    return %c0_i32, %arg0 : i32, i32
  }
  func.func @transform_1(%arg0: i32) -> (i32, i32) {
    %c0_i32 = arith.constant 0 : i32
    %c0_i32_0 = arith.constant 0 : i32
    %c0_i32_1 = arith.constant 0 : i32
    return %c0_i32, %c0_i32_0 : i32, i32
  }
  func.func @transform_2(%arg0: i32) -> (i32, i32) {
    %c0_i32 = arith.constant 0 : i32
    %c0_i32_0 = arith.constant 0 : i32
    %c0_i32_1 = arith.constant 0 : i32
    return %c0_i32, %c0_i32_0 : i32, i32
  }
  func.func @transform_3(%arg0: i32) -> (i32, i32) {
    %c0_i32 = arith.constant 0 : i32
    %c0_i32_0 = arith.constant 0 : i32
    return %c0_i32, %arg0 : i32, i32
  }
}

</mosaic_0001>

<bundles_post_ra>
// kernel: tpu_custom_call.1
= control target key start
LH: loop header
LB: loop body
LE: loop exit
PB: predicated region body
PF: predicated region fallthrough
CT: control target
= control target key end

     0   :  { %vm34_vm0 = vcmask 1045504   ;;  %v134_v0 = vmov 0.0   ;;  %vm135_vm1 = vmmov 0   ;;  %s179_s0 = inlined_call_operand.vmem [shape: bf16[12,128], index: 0, kind: input, shape index: {}]   ;;  %s180_s1 = inlined_call_operand.vmem [shape: bf16[8,12], index: 1, kind: input, shape index: {}]   ;;  %s181_s2 = inlined_call_operand.vmem [shape: f32[8,1], index: 2, kind: input, shape index: {}]   ;;  %s182_s3 = inlined_call_operand.hbm [shape: f32[8,128], index: 3, kind: output, shape index: {}]  }
   0x1   :  { %98 = vmatprep.subr.bf16.mxu0 %v134_v0  ;;  %v109_v1 = vld [vmem:[%s179_s0] sm:$0x3f]   ;;  %100 = vmatprep.mubr.msk.bf16.mxu0 %vm135_vm1, %v134_v0 }
   0x2   :  { %v19_v2 = vld [vmem:[%s181_s2] sm:$0xff] }
   0x3   :  { %8 = vsyncpa [#allocation3], 0  ;;  %v36_v3 = vsel %vm34_vm0, %v109_v1, 0  ;;  %v136_v4 = vmov 0   ;;  %v16_v5 = vld [vmem:[%s180_s1] sm:$0xf] }
   0x4   :  { %108 = vset.pattern.permute.xlu0 %v136_v4  ;;  %99 = vmatpush3.bf16.msra.mxu0 %v36_v3  ;;  %vm30_vm2 = vcmask 97280   ;;  %s137_s0 = smov [#allocation2]  }
   0x5   :  { %22 = vperm.xlu0 %108, %v19_v2   ;;  %s86_s18 = sshll.u32 %s137_s0, 4  ;;  %s87_s18 = int_to_ptr.vmem [resolvable:$true] %s86_s18 }
   0x6   :  { %s110_s2 = scalar_lea.vmem %s87_s18, 128  ;;  %p115_p1 = scmp.lt.s32.totalorder %s87_s18, %s87_s18 }
   0x7   :  { %101 = vmatmul.mubr.msk.bf16.vlgmr.msra.gmra.mrb[0].mxu0 %vm30_vm2, %v16_v5  ;;  %p111_p0 = scmp.ne.s32.totalorder %s87_s18, %s110_s2  ;;  %p116_p2 = scmp.lt.s32.totalorder %s110_s2, %s110_s2 }
   0x9   :  { %p117_p3 = por %p116_p2, %p115_p1 }
   0xb   :  { %p118_p4 = pnand %p117_p3, %p111_p0 }
  0x84   :  { %v23_v6 = vpop.permute.xlu0 %22 }
  0xda   :  { %v72_v7 = vpop.f32.mrb[0].mxu0 }
  0xdb   :  { %v73_v8 = vadd.f32 %v72_v7, %v23_v6  ;;  %v102_v9 = vpop.f32.mrb[1].mxu0 }
  0xdc   :  { %v75_v10 = vpop.f32.mrb[2].mxu0 }
  0xdd   :  { %v78_v11 = vmax.f32 %v73_v8, 0.0  ;;  %v103_v12 = vpop.f32.mrb[3].mxu0 }
  0xdf   :  { %79 = vst [vmem:[#allocation2] sm:$0xff] %v78_v11 }
  0xe0   :  { %121 = shalt.err (!%p118_p4)
}
  0xe1   :  { %s122_s20 = scalar_lea.hbm %s182_s3, 128 }
  0xe2   :  { %p123_p5 = scmp.ne.s32.totalorder %s182_s3, %s122_s20  ;;  %p126_p6 = scmp.lt.u32.totalorder %s122_s20, %s182_s3 }
  0xe4   :  { %p128_p7 = pnand %p126_p6, %p123_p5 }
  0xe6   :  { %131 = shalt.err (!%p128_p7)
}
  0xe7   :  { %89 = dma.vmem_to_hbm [thread:$0]  %s87_s18, 128, %s182_s3, [#allocation3]  }
  0xe8   :  { %132 = dma.done.wait [#allocation3], 128  }
  0xe9   :  { %133 = vsyncadd [#allocation3], 4294967168 }
  0xea   :  { %93 = vsyncpa [#allocation3], 1 }

</bundles_post_ra>
